<compile_context>
chip_gen: v7x
topology: tpu7x:2x2x1
jax: 0.10.0
libtpu: 0.0.40
codegen_flags: <defaults>
</compile_context>

<pallas_src>
import functools
import math

import jax
import jax.numpy as jnp
from jax.experimental import pallas as pl
from jax.experimental.pallas import tpu as pltpu

LN_EPS = 1e-5


def embed_kernel(x_ref, w_ref, b_ref, pe_ref, g_ref, beta_ref, o_ref,
                 *, use_bf16_matmul: bool):
    """One (batch, variate-token-tile) grid step.

    x_ref   : (L, tile_N)   -- native [B, L, N] layout, batch dim squeezed
    w_ref   : (L, D)
    b_ref   : (1, D)
    pe_ref  : (tile_N, D)
    g_ref   : (1, D)        -- LayerNorm gamma
    beta_ref: (1, D)        -- LayerNorm beta
    o_ref   : (tile_N, D)
    """
    x = x_ref[...]
    w = w_ref[...]
    if use_bf16_matmul:  # v6e/v7x MXU fast path (breaks exact f32 parity)
        x = x.astype(jnp.bfloat16)
        w = w.astype(jnp.bfloat16)

    # value embedding: contract seq_len (dim 0 of both operands). This also
    # performs the [B, L, N] -> [B, N, D] permute for free on the MXU.
    y = jax.lax.dot_general(
        x, w, (((0,), (0,)), ((), ())),
        preferred_element_type=jnp.float32)               # (tile_N, D), f32 acc

    # bias + positional encoding over the variate-token axis
    y = y + b_ref[...] + pe_ref[...]

    # LayerNorm over d_model (f32)
    mean = jnp.mean(y, axis=-1, keepdims=True)
    centered = y - mean
    var = jnp.mean(centered * centered, axis=-1, keepdims=True)
    inv = jax.lax.rsqrt(var + LN_EPS)
    y = centered * inv * g_ref[...] + beta_ref[...]

    # Dropout: identity in eval/inference mode.
    o_ref[...] = y.astype(o_ref.dtype)


def _pick_tile_n(n):
    """MXU-M tile over the variate-token axis (lane/sublane friendly)."""
    for t in (256, 128):
        if n % t == 0:
            return t
    return n  # small / irregular N: one full-extent block


def data_embedding_inverted(x, w, b, pe, gamma, beta, *,
                            use_bf16_matmul=False, out_dtype=jnp.float32):
    """x: [B, seq_len, n_vars] -> [B, n_vars, d_model]. No host-side transpose."""
    B, L, N = x.shape
    D = w.shape[1]

    tile_n = _pick_tile_n(N)
    n_tiles = N // tile_n

    b2 = b.reshape(1, D)
    g2 = gamma.reshape(1, D)
    be2 = beta.reshape(1, D)

    kernel = functools.partial(embed_kernel, use_bf16_matmul=use_bf16_matmul)

    return pl.pallas_call(
        kernel,
        out_shape=jax.ShapeDtypeStruct((B, N, D), out_dtype),
        grid_spec=pltpu.PrefetchScalarGridSpec(
            num_scalar_prefetch=0,
            grid=(B, n_tiles),
            in_specs=[
                # x in native [B, L, N] layout; batch squeezed, variate tiled.
                pl.BlockSpec((pl.Squeezed(), L, tile_n), lambda i, j: (i, 0, j)),
                pl.BlockSpec((L, D), lambda i, j: (0, 0)),        # W (resident)
                pl.BlockSpec((1, D), lambda i, j: (0, 0)),        # bias
                pl.BlockSpec((tile_n, D), lambda i, j: (j, 0)),   # PE row tile
                pl.BlockSpec((1, D), lambda i, j: (0, 0)),        # gamma
                pl.BlockSpec((1, D), lambda i, j: (0, 0)),        # beta
            ],
            out_specs=pl.BlockSpec((pl.Squeezed(), tile_n, D),
                                   lambda i, j: (i, j, 0)),
        ),
        compiler_params=pltpu.CompilerParams(
            dimension_semantics=("parallel", "parallel")),
    )(x, w, b2, pe, g2, be2)


def make_positional_encoding(n_positions, d_model):
    """Standard transformer sin/cos PE table, rows = variate-token positions."""
    position = jnp.arange(n_positions, dtype=jnp.float32)[:, None]            # (N, 1)
    div_term = jnp.exp(jnp.arange(0, d_model, 2, dtype=jnp.float32)
                       * (-math.log(10000.0) / d_model))                      # (D/2,)
    pe = jnp.zeros((n_positions, d_model), dtype=jnp.float32)
    pe = pe.at[:, 0::2].set(jnp.sin(position * div_term))
    pe = pe.at[:, 1::2].set(jnp.cos(position * div_term))
    return pe


def reference(x, w, b, pe, gamma, beta):
    """Pure-JAX reference of the PyTorch forward (inference)."""
    y = jnp.einsum('bln,ld->bnd', x, w) + b
    y = y + pe[None]
    mean = jnp.mean(y, axis=-1, keepdims=True)
    var = jnp.mean((y - mean) ** 2, axis=-1, keepdims=True)
    y = (y - mean) / jnp.sqrt(var + LN_EPS) * gamma + beta
    return y


if __name__ == "__main__":
    # Small but lane-dense demo config: d_model = 128 keeps output stores
    # unmasked (full 128-lane vst) while staying tiny.
    B, seq_len, n_vars, d_model = 2, 16, 8, 128

    key = jax.random.PRNGKey(0)
    k_x, k_w, k_b = jax.random.split(key, 3)

    x = jax.random.normal(k_x, (B, seq_len, n_vars), dtype=jnp.float32)

    # nn.Linear(seq_len, d_model): weight [d_model, seq_len] ~ U(-1/sqrt(L), 1/sqrt(L))
    bound = 1.0 / math.sqrt(seq_len)
    w_t = jax.random.uniform(k_w, (d_model, seq_len), minval=-bound, maxval=bound,
                             dtype=jnp.float32)
    w = w_t.T                                                  # [L, D]
    b = jax.random.uniform(k_b, (d_model,), minval=-bound, maxval=bound,
                           dtype=jnp.float32)

    pe = make_positional_encoding(n_vars, d_model)             # [N, D]

    # nn.LayerNorm defaults: weight=1, bias=0
    gamma = jnp.ones((d_model,), dtype=jnp.float32)
    beta = jnp.zeros((d_model,), dtype=jnp.float32)

    out = data_embedding_inverted(x, w, b, pe, gamma, beta,
                                  use_bf16_matmul=False, out_dtype=jnp.float32)
    out = jax.block_until_ready(out)

    ref = reference(x, w, b, pe, gamma, beta)
    assert out.shape == (B, n_vars, d_model)
    assert jnp.allclose(out, ref, atol=1e-5, rtol=1e-5), "mismatch vs reference"

    print("KERNEL_OK")
</pallas_src>

<mosaic_0001>
module attributes {stable_mosaic.version = 11 : i64} {
  func.func @embed_kernel(%arg0: i32, %arg1: i32, %arg2: memref<1x16x8xf32, #tpu.memory_space<vmem>>, %arg3: memref<16x128xf32, #tpu.memory_space<vmem>>, %arg4: memref<1x128xf32, #tpu.memory_space<vmem>>, %arg5: memref<8x128xf32, #tpu.memory_space<vmem>>, %arg6: memref<1x128xf32, #tpu.memory_space<vmem>>, %arg7: memref<1x128xf32, #tpu.memory_space<vmem>>, %arg8: memref<1x8x128xf32, #tpu.memory_space<vmem>>) attributes {dimension_semantics = [#tpu.dimension_semantics<parallel>, #tpu.dimension_semantics<parallel>], iteration_bounds = array<i64: 2, 1>, scalar_prefetch = 0 : i64, scratch_operands = 0 : i64, tpu.core_type = #tpu.core_type<tc>, window_params = [{transform_indices = @transform_0, window_bounds = array<i64: 1, 16, 8>}, {pipeline_mode = #tpu.pipeline_mode<synchronous>, transform_indices = @transform_1, window_bounds = array<i64: 16, 128>}, {pipeline_mode = #tpu.pipeline_mode<synchronous>, transform_indices = @transform_2, window_bounds = array<i64: 1, 128>}, {transform_indices = @transform_3, window_bounds = array<i64: 8, 128>}, {pipeline_mode = #tpu.pipeline_mode<synchronous>, transform_indices = @transform_4, window_bounds = array<i64: 1, 128>}, {pipeline_mode = #tpu.pipeline_mode<synchronous>, transform_indices = @transform_5, window_bounds = array<i64: 1, 128>}, {transform_indices = @transform_6, window_bounds = array<i64: 1, 8, 128>}]} {
    %c0 = arith.constant 0 : index
    %c0_0 = arith.constant 0 : index
    %c0_1 = arith.constant 0 : index
    %0 = vector.load %arg2[%c0, %c0_0, %c0_1] : memref<1x16x8xf32, #tpu.memory_space<vmem>>, vector<1x16x8xf32>
    %1 = vector.shape_cast %0 : vector<1x16x8xf32> to vector<16x8xf32>
    %c0_2 = arith.constant 0 : index
    %c0_3 = arith.constant 0 : index
    %2 = vector.load %arg3[%c0_2, %c0_3] : memref<16x128xf32, #tpu.memory_space<vmem>>, vector<16x128xf32>
    %cst = arith.constant dense<0.000000e+00> : vector<8x128xf32>
    %3 = tpu.matmul %1, %2, %cst {dimension_numbers = #tpu.dot_dimension_numbers<[0], [0], [1], [1], [0, 1, 1, 1], [], []>} : vector<16x8xf32>, vector<16x128xf32>, vector<8x128xf32> -> vector<8x128xf32>
    %c0_4 = arith.constant 0 : index
    %c0_5 = arith.constant 0 : index
    %4 = vector.load %arg4[%c0_4, %c0_5] : memref<1x128xf32, #tpu.memory_space<vmem>>, vector<1x128xf32>
    %5 = vector.broadcast %4 : vector<1x128xf32> to vector<8x128xf32>
    %6 = arith.addf %3, %5 : vector<8x128xf32>
    %c0_6 = arith.constant 0 : index
    %c0_7 = arith.constant 0 : index
    %7 = vector.load %arg5[%c0_6, %c0_7] : memref<8x128xf32, #tpu.memory_space<vmem>>, vector<8x128xf32>
    %8 = arith.addf %6, %7 : vector<8x128xf32>
    %cst_8 = arith.constant dense<0.000000e+00> : vector<8xf32>
    %9 = vector.multi_reduction <add>, %8, %cst_8 [1] : vector<8x128xf32> to vector<8xf32>
    %10 = vector.shape_cast %9 : vector<8xf32> to vector<8x1xf32>
    %cst_9 = arith.constant 1.280000e+02 : f32
    %11 = vector.broadcast %cst_9 : f32 to vector<8x1xf32>
    %12 = arith.divf %10, %11 : vector<8x1xf32>
    %13 = vector.broadcast %12 : vector<8x1xf32> to vector<8x128xf32>
    %14 = arith.subf %8, %13 : vector<8x128xf32>
    %15 = arith.mulf %14, %14 : vector<8x128xf32>
    %cst_10 = arith.constant dense<0.000000e+00> : vector<8xf32>
    %16 = vector.multi_reduction <add>, %15, %cst_10 [1] : vector<8x128xf32> to vector<8xf32>
    %17 = vector.shape_cast %16 : vector<8xf32> to vector<8x1xf32>
    %cst_11 = arith.constant 1.280000e+02 : f32
    %18 = vector.broadcast %cst_11 : f32 to vector<8x1xf32>
    %19 = arith.divf %17, %18 : vector<8x1xf32>
    %cst_12 = arith.constant 9.99999974E-6 : f32
    %20 = vector.broadcast %cst_12 : f32 to vector<8x1xf32>
    %21 = arith.addf %19, %20 : vector<8x1xf32>
    %22 = math.rsqrt %21 : vector<8x1xf32>
    %23 = vector.broadcast %22 : vector<8x1xf32> to vector<8x128xf32>
    %24 = arith.mulf %14, %23 : vector<8x128xf32>
    %c0_13 = arith.constant 0 : index
    %c0_14 = arith.constant 0 : index
    %25 = vector.load %arg6[%c0_13, %c0_14] : memref<1x128xf32, #tpu.memory_space<vmem>>, vector<1x128xf32>
    %26 = vector.broadcast %25 : vector<1x128xf32> to vector<8x128xf32>
    %27 = arith.mulf %24, %26 : vector<8x128xf32>
    %c0_15 = arith.constant 0 : index
    %c0_16 = arith.constant 0 : index
    %28 = vector.load %arg7[%c0_15, %c0_16] : memref<1x128xf32, #tpu.memory_space<vmem>>, vector<1x128xf32>
    %29 = vector.broadcast %28 : vector<1x128xf32> to vector<8x128xf32>
    %30 = arith.addf %27, %29 : vector<8x128xf32>
    %c0_17 = arith.constant 0 : index
    %c0_18 = arith.constant 0 : index
    %c0_19 = arith.constant 0 : index
    %31 = vector.load %arg8[%c0_17, %c0_18, %c0_19] : memref<1x8x128xf32, #tpu.memory_space<vmem>>, vector<1x8x128xf32>
    %32 = vector.shape_cast %31 : vector<1x8x128xf32> to vector<8x128xf32>
    %33 = vector.shape_cast %30 : vector<8x128xf32> to vector<1x8x128xf32>
    tpu.vector_store %arg8[%c0_17, %c0_18, %c0_19], %33 {strides = array<i32>} : memref<1x8x128xf32, #tpu.memory_space<vmem>>, vector<1x8x128xf32>,
    return
  }
  func.func @transform_0(%arg0: i32, %arg1: i32) -> (i32, i32, i32) {
    %c0_i32 = arith.constant 0 : i32
    %c0_i32_0 = arith.constant 0 : i32
    return %arg0, %c0_i32, %arg1 : i32, i32, i32
  }
  func.func @transform_1(%arg0: i32, %arg1: i32) -> (i32, i32) {
    %c0_i32 = arith.constant 0 : i32
    %c0_i32_0 = arith.constant 0 : i32
    %c0_i32_1 = arith.constant 0 : i32
    return %c0_i32, %c0_i32_0 : i32, i32
  }
  func.func @transform_2(%arg0: i32, %arg1: i32) -> (i32, i32) {
    %c0_i32 = arith.constant 0 : i32
    %c0_i32_0 = arith.constant 0 : i32
    %c0_i32_1 = arith.constant 0 : i32
    return %c0_i32, %c0_i32_0 : i32, i32
  }
  func.func @transform_3(%arg0: i32, %arg1: i32) -> (i32, i32) {
    %c0_i32 = arith.constant 0 : i32
    %c0_i32_0 = arith.constant 0 : i32
    return %arg1, %c0_i32 : i32, i32
  }
  func.func @transform_4(%arg0: i32, %arg1: i32) -> (i32, i32) {
    %c0_i32 = arith.constant 0 : i32
    %c0_i32_0 = arith.constant 0 : i32
    %c0_i32_1 = arith.constant 0 : i32
    return %c0_i32, %c0_i32_0 : i32, i32
  }
  func.func @transform_5(%arg0: i32, %arg1: i32) -> (i32, i32) {
    %c0_i32 = arith.constant 0 : i32
    %c0_i32_0 = arith.constant 0 : i32
    %c0_i32_1 = arith.constant 0 : i32
    return %c0_i32, %c0_i32_0 : i32, i32
  }
  func.func @transform_6(%arg0: i32, %arg1: i32) -> (i32, i32, i32) {
    %c0_i32 = arith.constant 0 : i32
    %c0_i32_0 = arith.constant 0 : i32
    return %arg0, %arg1, %c0_i32 : i32, i32, i32
  }
}

</mosaic_0001>

<bundles_post_ra>
// kernel: tpu_custom_call.1
= control target key start
LH: loop header
LB: loop body
LE: loop exit
PB: predicated region body
PF: predicated region fallthrough
CT: control target
= control target key end

     0   :  { %11 = vsyncpa [#allocation3], 0  ;;  %s884_s0 = inlined_call_operand.vmem [shape: f32[2,16,8], index: 0, kind: input, shape index: {}]   ;;  %s885_s1 = inlined_call_operand.vmem [shape: f32[16,128], index: 1, kind: input, shape index: {}]   ;;  %s886_s2 = inlined_call_operand.vmem [shape: f32[1,128], index: 2, kind: input, shape index: {}]   ;;  %s887_s3 = inlined_call_operand.vmem [shape: f32[8,128], index: 3, kind: input, shape index: {}]   ;;  %s888_s4 = inlined_call_operand.vmem [shape: f32[1,128], index: 4, kind: input, shape index: {}]   ;;  %s889_s5 = inlined_call_operand.vmem [shape: f32[1,128], index: 5, kind: input, shape index: {}]   ;;  %s890_s6 = inlined_call_operand.hbm [shape: f32[2,8,128], index: 6, kind: output, shape index: {}]  }
   0x1   :  { %13 = vsyncpa [#allocation3 + $0x1], 0  ;;  %s754_s21 = smov 0   ;;  %s756_s22 = smov 0  }
   0x2   :  { %s758_s23 = smov 0   ;;  %s760_s24 = smov 0  }
   0x3   :  { %s762_s25 = smov 0   ;;  %s764_s26 = smov 0  }
   0x4 LB: > { %s544_s27 = sadd.s32 4294967295, %s713_s26   ;;  %s545_s28 = sadd.s32 4294967294, %s713_s26   ;;  %s713_s26 = sphi %s764_s26, %s19_s26   ;;  %s709_s25 = sphi %s762_s25, %s897_s25   ;;  %s705_s24 = sphi %s760_s24, %s896_s24   ;;  %s701_s23 = sphi %s758_s23, %s895_s23   ;;  %s697_s22 = sphi %s756_s22, %s894_s22   ;;  %s693_s21 = sphi %s754_s21, %s893_s21  }
   0x5   : > { %s31_s29 = sadd.s32 1, %s709_s25  ;;  %s178_s30 = sadd.s32 1, %s701_s23 }
   0x6   : > { %p33_p0 = scmp.ge.s32.totalorder %s31_s29, 2  ;;  %p188_p1 = scmp.ne.s32.totalorder %s701_s23, %s697_s22 }
   0x7   : > { %p189_p2 = scmp.eq.s32.totalorder %s544_s27, 1  ;;  %p194_p3 = scmp.ne.s32.totalorder %s697_s22, %s693_s21 }
   0x8   : > { %s899_s29 = smov (%p33_p0, %s31_s29), 0  ;;  %p195_p5 = scmp.eq.s32.totalorder %s545_s28, 1 }
   0x9   : > { %p794_p4 = por %p189_p2, %p188_p1  ;;  %s173_s8 = ssub.s32 %s709_s25, %s899_s29 }
   0xa   : > { %p549_p6 = scmp.ge.s32.totalorder %s713_s26, 1  ;;  %p176_p7 = scmp.eq.s32.totalorder %s173_s8, 0 }
   0xb   : > { %p801_p8 = por %p195_p5, %p194_p3  ;;  %p243_p9 = scmp.lt.s32.totalorder %s713_s26, 3 }
   0xc   : > { %s807_s10 = scalar_select %p176_p7, %s701_s23, %s178_s30  }
   0xd   : > { %p244_p10 = pnand %p549_p6, %p243_p9 }
   0xe   : > { %p280_p11 = scmp.lt.s32.totalorder (!%p244_p10), %s705_s24, 1  ;;  %v294_v0 = vld [vmem:[%s885_s1] sm:$0xff] (!%p244_p10)  ;;  %v295_v1 = vld [vmem:[%s885_s1 + $0x8] sm:$0xff] (!%p244_p10)  ;;  %v715_v2 = vmov (!%p244_p10), 0.0|0.0   ;;  %vm716_vm0 = vmmov (!%p244_p10), 0   ;;  %v717_v4 = vmov (!%p244_p10), 0.0  }
   0xf   : > { %247 = sbr.rel (%p244_p10) target bundleno = 697 (0x2b9), region = 44  ;;  %572 = vmatprep.subr.bf16.mxu0 (!%p244_p10), %v715_v2  ;;  %v573_v3 = vpack.c.bf16 (!%p244_p10), %v295_v1, %v294_v0  ;;  %569 = vmatprep.mubr.msk.f32.mxu0 (!%p244_p10), %vm716_vm0, %v717_v4  ;;  %vm335_vm1 = vcmask (!%p244_p10), 130048   ;;  %v553_v8 = vld [vmem:[%s886_s2] ss:$0 sm:$0xff] (!%p244_p10)  ;;  %s277_s8 = sand.u32 (!%p244_p10), 1, %s697_s22  }
  0x10   : > { %v409_v10 = vld [vmem:[%s887_s3] sm:$0xff] (!%p244_p10)  ;;  %s550_s11 = sshll.u32 (!%p244_p10), %s277_s8, 3  ;;  %s441_s28 = scalar_lea.sflag (!%p244_p10), [#allocation3], %s277_s8 }
  0x11   : > { %574 = vmatpush3.bf16.msra.mxu0 (!%p244_p10), %v573_v3  ;;  %v555_v22 = vld [vmem:[%s888_s4] ss:$0 sm:$0xff] (!%p244_p10)  ;;  %s279_s17 = scalar_lea.vmem (!%p244_p10), [#allocation2], %s550_s11 }
  0x12   : > { %v556_v24 = vld [vmem:[%s889_s5] ss:$0 sm:$0xff] (!%p244_p10)  ;;  %s455_s18 = sshll.u32 (!%p244_p10), %s279_s17, 4  ;;  %s839_s18 = int_to_ptr.vmem [resolvable:$true] %s455_s18 }
  0x13   : > { %s635_s30 = scalar_lea.vmem (!%p244_p10), %s839_s18, 128 }
  0x14   : > { %p636_p12 = scmp.ne.s32.totalorder (!%p244_p10), %s839_s18, %s635_s30 }
  0x16   : > { %s281_s15 = scalar_select %p280_p11, %s705_s24, 1 }
  0x17   : > { %p637_p13 = pnand %p636_p12, %p794_p4 }
  0x18   : > { %s561_s16 = sshll.u32 %s281_s15, 4 }
  0x19   : > { %s287_s19 = scalar_lea.vmem %s884_s0, %s561_s16  ;;  %s558_s16 = sshll.u32 %s705_s24, 7 }
  0x1a   : > { %v292_v5 = vld [vmem:[%s287_s19] sm:$0xff]  ;;  %v293_v6 = vld [vmem:[%s287_s19 + $0x8] sm:$0xff]  ;;  %s837_s27 = scalar_lea.hbm %s890_s6, %s558_s16  ;;  %p638_p0 = pneg %p637_p13 }
  0x1b   : > { %303 = vxpose.xlu0.b32.start [1/2] (short) (narrow) %v292_v5, 8  ;;  %s718_s24 = smov [#allocation2]  }
  0x1c   : > { %s639_s11 = sshll.u32 %s718_s24, 4  ;;  %s640_s11 = int_to_ptr.vmem [resolvable:$false] %s639_s11 }
  0x1d   : > { %s641_s12 = scalar_lea.vmem %s640_s11, 256  ;;  %p642_p1 = scmp.lt.s32.totalorder %s839_s18, %s640_s11 }
  0x1e   : > { %p643_p2 = scmp.lt.s32.totalorder %s641_s12, %s635_s30 }
  0x1f   : > { %304 = vxpose.xlu0.b32.end [2/2] (short) (narrow) %v293_v6, 8 }
  0x20   : > { %p644_p3 = por %p643_p2, %p642_p1 }
  0x22   : > { %p645_p5 = pnand %p644_p3, %p638_p0 }
  0x9b   : > { %v319_v7 = vpop.trf.xlu0 }
  0x9c   : > { %570 = vmatmul.mubr.msk.f32.vlgmr.msra.gmra.mrb[0].mxu0 %vm335_vm1, %v319_v7 }
 0x16f   : > { %v405_v9 = vpop.f32.mrb[0].mxu0 }
 0x170   : > { %v406_v11 = vadd.f32 %v553_v8, %v405_v9  ;;  %v571_v12 = vpop.f32.mrb[1].mxu0 }
 0x172   : > { %v410_v13 = vadd.f32 %v409_v10, %v406_v11 }
 0x174   : > { %411 = vadd.xlane.f32.xlu1 %v410_v13 }
 0x201   : > { %v412_v14 = vpop.xlane.xlu1 %411 }
 0x202   : > { %v414_v15 = vmul.f32 0.0078125, %v412_v14 }
 0x204   : > { %v415_v16 = vsub.f32 %v410_v13, %v414_v15 }
 0x206   : > { %v416_v17 = vmul.f32 %v415_v16, %v415_v16 }
 0x208   : > { %417 = vadd.xlane.f32.xlu1 %v416_v17 }
 0x295   : > { %v418_v18 = vpop.xlane.xlu1 %417 }
 0x296   : > { %v419_v19 = vmul.f32 0.0078125, %v418_v18 }
 0x298   : > { %v420_v20 = vadd.f32 1e-05, %v419_v19 }
 0x29a   : > { %633 = vrsqrt.f32 %v420_v20 }
 0x2a4   : > { %v634_v21 = vpop.eup %633 }
 0x2a5   : > { %v422_v23 = vmul.f32 %v634_v21, %v415_v16 }
 0x2a7   : > { %v430_v25 = vmul.f32 %v555_v22, %v422_v23 }
 0x2a9   : > { %v438_v26 = vadd.f32 %v556_v24, %v430_v25 }
 0x2ab   : > { %439 = vst [vmem:[%s279_s17] sm:$0xff] %v438_v26 }
 0x2ac   : > { %648 = shalt.err (!%p645_p5)
}
 0x2ad   : > { %s649_s8 = scalar_lea.hbm %s837_s27, 128  ;;  %s653_s15 = scalar_lea.hbm %s890_s6, 256 }
 0x2ae   : > { %p650_p6 = scmp.ne.s32.totalorder %s837_s27, %s649_s8  ;;  %p654_p10 = scmp.lt.u32.totalorder %s837_s27, %s890_s6 }
 0x2af   : > { %p655_p11 = scmp.lt.u32.totalorder %s653_s15, %s649_s8  ;;  %p657_p13 = scmp.lt.u32.totalorder %s649_s8, %s837_s27 }
 0x2b0   : > { %p651_p7 = pnand %p650_p6, %p794_p4 }
 0x2b1   : > { %p656_p12 = por %p655_p11, %p654_p10 }
 0x2b2   : > { %p652_p9 = pneg %p651_p7 }
 0x2b3   : > { %p658_p0 = por %p657_p13, %p656_p12 }
 0x2b5   : > { %p659_p1 = pnand %p658_p0, %p652_p9 }
 0x2b7   : > { %662 = shalt.err (!%p659_p1)
}
 0x2b8   : > { %575 = dma.vmem_to_hbm [thread:$0]  (%p794_p4), %s839_s18, 128, %s837_s27, %s441_s28  }
 0x2b9 PF: > { %p581_p2 = scmp.ge.s32.totalorder %s713_s26, 2  ;;  %s467_s19 = sand.u32 1, %s693_s21  }
 0x2ba   : > { %s468_s20 = scalar_lea.sflag [#allocation3], %s467_s19 }
 0x2bb   : > { %p578_p3 = pnand %p581_p2, %p801_p8 }
 0x2bd   : > { %688 = dma.done.wait (!%p578_p3), %s468_s20, 128  }
 0x2be   : > { %690 = vsyncadd (!%p578_p3), %s468_s20, 4294967168  ;;  %s19_s26 = sadd.s32 1, %s713_s26   ;;  %s893_s21 = smov %s697_s22 }
 0x2bf   : > { %p16_p5 = scmp.ge.s32.totalorder %s19_s26, 4   ;;  %s894_s22 = smov %s701_s23 }
 0x2c0   : > { %s895_s23 = smov %s807_s10  ;;  %s896_s24 = smov %s709_s25 }
 0x2c1   : > { %s897_s25 = smov %s899_s29  ;;  %18 = sbr.rel (!%p16_p5) target bundleno = 4 (0x4), region = 82 }
 0x2c8   :  { %473 = vsyncpa [#allocation3], 1 }
 0x2c9   :  { %475 = vsyncpa [#allocation3 + $0x1], 1 }

</bundles_post_ra>
